<compile_context>
chip_gen: v7x
topology: tpu7x:2x2x1
jax: 0.10.0
libtpu: 0.0.40
codegen_flags: <defaults>
</compile_context>

<pallas_src>
import math

import jax
import jax.numpy as jnp
from jax.experimental import pallas as pl
from jax.experimental.pallas import tpu as pltpu

_HALF_LOG_2PI = 0.5 * math.log(2.0 * math.pi)


def _cdiv(a, b):
    return -(-a // b)


def _mixture_elbo_kernel(fscal_ref,          # SMEM f32 (3,): 1/temperature, annealing factor, 1/len(dataloader)
                         iscal_ref,          # SMEM i32 (1,): true batch size N (pre-padding)
                         x_ref,              # (D, TN)   features x batch-tile (batch on lanes)
                         logits_ref,         # (K, TN)
                         gumbel_ref,         # (K, TN)
                         theta_loc_ref,      # (P, K)    P = 2*D rows: [locs ; raw scales]
                         theta_rho_ref,      # (P, K)
                         eps_ref,            # (P, K)    N(0,1) noise for q_theta.rsample()
                         out_ref,            # (1, 8, 128) per-core partial -elbo (broadcast)
                         theta_sc,           # VMEM (P, K)  sampled theta (hoisted to step 0)
                         theta_scale_sc,     # VMEM (P, K)  softplus(theta_rho)
                         acc_ref):           # VMEM (1, TN) fused (loglik - af*klz) accumulator
    core = pl.program_id(0)
    step = pl.program_id(1)
    n_steps = pl.num_programs(1)

    inv_t = fscal_ref[0]
    af = fscal_ref[1]
    inv_len_dl = fscal_ref[2]
    n_true = iscal_ref[0]

    d = x_ref.shape[0]
    k = logits_ref.shape[0]
    tn = x_ref.shape[1]
    log_k = math.log(k)

    @pl.when(step == 0)
    def _sample_theta():
        # q_theta.rsample(): loc + softplus(rho) * eps  (once per core)
        t_scale = jax.nn.softplus(theta_rho_ref[...])
        theta_scale_sc[...] = t_scale
        theta_sc[...] = theta_loc_ref[...] + t_scale * eps_ref[...]

    logits = logits_ref[...]                                              # (K, TN)

    # --- q_z(logits, temperature).rsample(): Gumbel-softmax over clusters ---
    # manual softmax: exp + approx EUP reciprocal (+ Newton) on the (1,TN) sum.
    s = (logits + gumbel_ref[...]) * inv_t
    s_max = jnp.max(s, axis=0, keepdims=True)
    e_s = jnp.exp(s - s_max)
    sum_s = jnp.sum(e_s, axis=0, keepdims=True)
    r_s = pl.reciprocal(sum_s, approx=True)
    r_s = r_s * (2.0 - sum_s * r_s)
    z = e_s * r_s                                                         # (K, TN)

    # --- single fused MXU call: theta (P,K) @ z (K,TN) -> per-sample params ---
    theta_n = jax.lax.dot_general(theta_sc[...], z, (((1,), (0,)), ((), ())),
                                  preferred_element_type=jnp.float32)    # (P, TN)
    loc = theta_n[:d, :]                                                  # (D, TN)
    # unpack_params: greater_than(0) constraint -> lower + 1e-15 + softplus(.)
    scale = 1e-15 + jax.nn.softplus(theta_n[d:, :])                       # (D, TN)

    # --- Normal log-likelihood; approx EUP reciprocal + one Newton step ---
    r = pl.reciprocal(scale, approx=True)
    r = r * (2.0 - scale * r)                                             # ~f32-exact 1/scale
    zz = (x_ref[...] - loc) * r
    ll_cols = (jnp.sum(-0.5 * zz * zz - jnp.log(scale), axis=0, keepdims=True)
               - d * _HALF_LOG_2PI)                                       # (1, TN)

    # --- KL(OneHotCategorical(logits) || uniform prior): fused softmax/log_softmax ---
    l_max = jnp.max(logits, axis=0, keepdims=True)
    e_l = jnp.exp(logits - l_max)
    sum_l = jnp.sum(e_l, axis=0, keepdims=True)
    r_l = pl.reciprocal(sum_l, approx=True)
    r_l = r_l * (2.0 - sum_l * r_l)
    logq = (logits - l_max) - jnp.log(sum_l)
    q = e_l * r_l                                                         # reuse exps; no exp(logq)
    klz_cols = jnp.sum(q * (logq + log_k), axis=0, keepdims=True)         # (1, TN)

    # --- mask padded batch columns (batch padded to steps*tile_n*num_cores) ---
    col0 = (core * n_steps + step) * tn
    lane = jax.lax.broadcasted_iota(jnp.int32, (1, tn), 1) + col0
    valid = (lane < n_true).astype(jnp.float32)

    contrib = valid * (ll_cols - af * klz_cols)                           # (1, TN)

    @pl.when(step == 0)
    def _write():
        acc_ref[...] = contrib

    @pl.when(step > 0)
    def _accum():
        acc_ref[...] = acc_ref[...] + contrib

    @pl.when(step == n_steps - 1)
    def _final():
        # kl_divergence(q_theta, Normal(0,1)).sum() / len(dataloader); once (core 0)
        t_loc = theta_loc_ref[...]
        t_scale = theta_scale_sc[...]
        kl_theta = jnp.sum(-jnp.log(t_scale)
                           + 0.5 * (t_scale * t_scale + t_loc * t_loc - 1.0)) * inv_len_dl
        kl_theta = jnp.where(core == 0, kl_theta, 0.0)
        # -elbo partial = -(sum(ll - af*klz) - af*kl_theta)
        neg_elbo_part = af * kl_theta - jnp.sum(acc_ref[...])
        out_ref[...] = jnp.full(out_ref.shape, neg_elbo_part, jnp.float32)


def _default_num_cores():
    """2 TensorCores only on v7x; v5e/v6e are single-TC (parallel axis would be a serial pass)."""
    try:
        kind = jax.devices()[0].device_kind.lower()
        if "v7" in kind:
            return 2
    except Exception:
        pass
    return 1


def _tpu_vmem_bytes():
    try:
        return int(pltpu.get_tpu_info().vmem_capacity_bytes)
    except Exception:
        return 128 << 20


def _choose_tile_n(n, num_cores, d, k, vmem_budget_bytes, max_tile=4096):
    """Largest multiple-of-128 lane tile within the VMEM budget (capped)."""
    # bytes per batch column: double-buffered streaming inputs (x + logits + gumbel),
    # the resident accumulator row, and Mosaic-materialized intermediates
    # (z, e_s, theta_n, loc/scale/r/zz, logq, q, ...).
    row_bytes = 4 * (2 * (d + 2 * k) + 8 + (6 * d + 4 * k))
    cap = max(128, (vmem_budget_bytes // row_bytes) // 128 * 128)
    cap = min(cap, max_tile)
    per_core = _cdiv(n, num_cores)
    return min(cap, _cdiv(per_core, 128) * 128)


def mixture_model_forward(x, zi_logits, theta_loc, theta_rho, eps_theta, gumbel,
                          *, temperature, annealing_factor, len_dataloader,
                          tile_n=None, num_cores=None):
    n, d = x.shape
    p, k = theta_loc.shape
    assert p == 2 * d

    # Lane-dense layout: batch on lanes (pure glue, plain JAX).
    x_t = x.T                    # (D, N)
    logits_t = zi_logits.T       # (K, N)
    gumbel_t = gumbel.T          # (K, N)

    # PyTorch row layout is (loc_0, scale_0, loc_1, scale_1, ...); de-interleave
    # to [locs ; scales] so the loc/scale split lands on a sublane boundary.
    def deinterleave(t):
        t = t.reshape(d, 2, k)
        return jnp.concatenate([t[:, 0, :], t[:, 1, :]], axis=0)

    tl, tr, ep = map(deinterleave, (theta_loc, theta_rho, eps_theta))

    if num_cores is None:
        num_cores = _default_num_cores()
    num_cores = max(1, min(num_cores, max(1, n // 128)))

    vmem_limit = min(48 << 20, _tpu_vmem_bytes() * 3 // 4)
    if tile_n is None:
        tile_n = _choose_tile_n(n, num_cores, d, k, vmem_budget_bytes=vmem_limit // 2)
    assert tile_n % 128 == 0

    steps = _cdiv(_cdiv(n, num_cores), tile_n)
    n_per_core = steps * tile_n
    n_pad = n_per_core * num_cores

    if n_pad != n:
        pad = n_pad - n
        x_t = jnp.pad(x_t, ((0, 0), (0, pad)))
        logits_t = jnp.pad(logits_t, ((0, 0), (0, pad)))
        gumbel_t = jnp.pad(gumbel_t, ((0, 0), (0, pad)))

    f_scalars = jnp.array([1.0 / temperature, annealing_factor, 1.0 / len_dataloader],
                          dtype=jnp.float32)
    i_scalars = jnp.array([n], dtype=jnp.int32)

    out = pl.pallas_call(
        _mixture_elbo_kernel,
        out_shape=jax.ShapeDtypeStruct((num_cores, 8, 128), jnp.float32),
        grid_spec=pltpu.PrefetchScalarGridSpec(
            num_scalar_prefetch=0,
            grid=(num_cores, steps),
            in_specs=[
                pl.BlockSpec(memory_space=pltpu.MemorySpace.SMEM),               # f32 scalars
                pl.BlockSpec(memory_space=pltpu.MemorySpace.SMEM),               # i32 scalars
                pl.BlockSpec((d, tile_n), lambda c, s: (0, c * steps + s)),      # x (D, N)
                pl.BlockSpec((k, tile_n), lambda c, s: (0, c * steps + s)),      # zi_logits (K, N)
                pl.BlockSpec((k, tile_n), lambda c, s: (0, c * steps + s)),      # gumbel (K, N)
                pl.BlockSpec((p, k), lambda c, s: (0, 0)),                       # theta_loc
                pl.BlockSpec((p, k), lambda c, s: (0, 0)),                       # theta_rho
                pl.BlockSpec((p, k), lambda c, s: (0, 0)),                       # eps_theta
            ],
            out_specs=pl.BlockSpec((1, 8, 128), lambda c, s: (c, 0, 0)),
            scratch_shapes=[
                pltpu.VMEM((p, k), jnp.float32),        # sampled theta
                pltpu.VMEM((p, k), jnp.float32),        # softplus(theta_rho)
                pltpu.VMEM((1, tile_n), jnp.float32),   # fused (loglik - af*klz) accumulator
            ]),
        compiler_params=pltpu.CompilerParams(
            dimension_semantics=("parallel", "arbitrary"),
            vmem_limit_bytes=vmem_limit),
    )(f_scalars, i_scalars, x_t, logits_t, gumbel_t, tl, tr, ep)

    # Per-core partial -elbo contributions (broadcast across each (8,128) slab).
    return jnp.sum(out[:, 0, 0])


def reference_forward(x, zi_logits, theta_loc, theta_rho, eps_theta, gumbel,
                      temperature, annealing_factor, len_dataloader):
    """Pure-JAX mirror of MixtureModel.forward (-elbo) for validation."""
    n, d = x.shape
    k = zi_logits.shape[1]
    q_scale = jax.nn.softplus(theta_rho)
    theta = theta_loc + q_scale * eps_theta                              # (P, K)
    z = jax.nn.softmax((zi_logits + gumbel) / temperature, axis=-1)      # (N, K)
    theta_n = jnp.einsum("nk,pk->np", z, theta,
                         precision=jax.lax.Precision.HIGHEST)            # (N, P)
    loc = theta_n[:, 0::2]
    scale = 1e-15 + jax.nn.softplus(theta_n[:, 1::2])
    lp = -0.5 * ((x - loc) / scale) ** 2 - jnp.log(scale) - _HALF_LOG_2PI
    re = lp.sum()
    logq = jax.nn.log_softmax(zi_logits, axis=-1)
    kl_z = (jnp.exp(logq) * (logq + math.log(k))).sum()
    kl_t = (-jnp.log(q_scale)
            + 0.5 * (q_scale ** 2 + theta_loc ** 2 - 1.0)).sum() / len_dataloader
    elbo = re - annealing_factor * (kl_z + kl_t)
    return -elbo


if __name__ == "__main__":
    key = jax.random.PRNGKey(0)
    N, D, K = 128, 8, 8          # batch, num features (univariate Normals), num clusters
    P = 2 * D                    # num_params = sum(size_params) = 2 per Normal
    kx, klg, ktl, ktr, keps, kg = jax.random.split(key, 6)

    x = jax.random.normal(kx, (N, D), jnp.float32)
    zi_logits = jax.random.normal(klg, (N, K), jnp.float32)

    # MixtureModel.__init__ (non-empirical path) parameter initialisation:
    #   theta_loc ~ U(-0.25, 0.25); theta_rho = log(exp(U(0, 0.5)) - 1)
    theta_loc = jax.random.uniform(ktl, (P, K), jnp.float32, -0.25, 0.25)
    u = jax.random.uniform(ktr, (P, K), jnp.float32, 0.0, 0.5)
    theta_rho = jnp.log(jnp.expm1(u))

    # Reparameterisation / Gumbel noise (drawn outside, passed into the kernel).
    eps_theta = jax.random.normal(keps, (P, K), jnp.float32)
    gumbel = jax.random.gumbel(kg, (N, K), jnp.float32)

    temperature = 0.5            # state.temperature
    annealing_factor = 1.0       # state.annealing_factor
    len_dataloader = 10          # len(state.dataloader)

    out = mixture_model_forward(
        x, zi_logits, theta_loc, theta_rho, eps_theta, gumbel,
        temperature=temperature, annealing_factor=annealing_factor,
        len_dataloader=len_dataloader)
    out = jax.block_until_ready(out)

    ref = reference_forward(
        x, zi_logits, theta_loc, theta_rho, eps_theta, gumbel,
        temperature, annealing_factor, len_dataloader)

    assert bool(jnp.isfinite(out)), out
    assert jnp.allclose(out, ref, rtol=5e-3, atol=0.5), (out, ref)
    print("KERNEL_OK")
</pallas_src>

<mosaic_0001>
module attributes {stable_mosaic.version = 11 : i64} {
  func.func @_mixture_elbo_kernel(%arg0: i32, %arg1: i32, %arg2: memref<3xf32, #tpu.memory_space<smem>>, %arg3: memref<1xi32, #tpu.memory_space<smem>>, %arg4: memref<8x128xf32, #tpu.memory_space<vmem>>, %arg5: memref<8x128xf32, #tpu.memory_space<vmem>>, %arg6: memref<8x128xf32, #tpu.memory_space<vmem>>, %arg7: memref<16x8xf32, #tpu.memory_space<vmem>>, %arg8: memref<16x8xf32, #tpu.memory_space<vmem>>, %arg9: memref<16x8xf32, #tpu.memory_space<vmem>>, %arg10: memref<1x8x128xf32, #tpu.memory_space<vmem>>, %arg11: memref<16x8xf32, #tpu.memory_space<vmem>>, %arg12: memref<16x8xf32, #tpu.memory_space<vmem>>, %arg13: memref<1x128xf32, #tpu.memory_space<vmem>>) attributes {dimension_semantics = [#tpu.dimension_semantics<parallel>, #tpu.dimension_semantics<arbitrary>], iteration_bounds = array<i64: 1, 1>, scalar_prefetch = 0 : i64, scratch_operands = 3 : i64, tpu.core_type = #tpu.core_type<tc>, window_params = [{transform_indices = @transform_0, window_bounds = array<i64: 3>}, {transform_indices = @transform_1, window_bounds = array<i64: 1>}, {transform_indices = @transform_2, window_bounds = array<i64: 8, 128>}, {transform_indices = @transform_3, window_bounds = array<i64: 8, 128>}, {transform_indices = @transform_4, window_bounds = array<i64: 8, 128>}, {pipeline_mode = #tpu.pipeline_mode<synchronous>, transform_indices = @transform_5, window_bounds = array<i64: 16, 8>}, {pipeline_mode = #tpu.pipeline_mode<synchronous>, transform_indices = @transform_6, window_bounds = array<i64: 16, 8>}, {pipeline_mode = #tpu.pipeline_mode<synchronous>, transform_indices = @transform_7, window_bounds = array<i64: 16, 8>}, {transform_indices = @transform_8, window_bounds = array<i64: 1, 8, 128>}]} {
    %c0 = arith.constant 0 : index
    %0 = memref.load %arg2[%c0] : memref<3xf32, #tpu.memory_space<smem>>
    %c1 = arith.constant 1 : index
    %1 = memref.load %arg2[%c1] : memref<3xf32, #tpu.memory_space<smem>>
    %c2 = arith.constant 2 : index
    %2 = memref.load %arg2[%c2] : memref<3xf32, #tpu.memory_space<smem>>
    %c0_0 = arith.constant 0 : index
    %3 = memref.load %arg3[%c0_0] : memref<1xi32, #tpu.memory_space<smem>>
    %c0_i32 = arith.constant 0 : i32
    %4 = arith.cmpi eq, %arg1, %c0_i32 : i32
    %5 = arith.extui %4 : i1 to i32
    %c0_i32_1 = arith.constant 0 : i32
    %6 = arith.cmpi ne, %5, %c0_i32_1 : i32
    scf.if %6 {
      %c0_31 = arith.constant 0 : index
      %c0_32 = arith.constant 0 : index
      %110 = vector.load %arg8[%c0_31, %c0_32] : memref<16x8xf32, #tpu.memory_space<vmem>>, vector<16x8xf32>
      %cst_33 = arith.constant 0.000000e+00 : f32
      %111 = vector.broadcast %cst_33 : f32 to vector<16x8xf32>
      %112 = arith.maximumf %110, %111 : vector<16x8xf32>
      %113 = vector.broadcast %cst_33 : f32 to vector<16x8xf32>
      %114 = arith.subf %110, %113 : vector<16x8xf32>
      %115 = arith.cmpf one, %114, %114 : vector<16x8xf32>
      %116 = vector.broadcast %cst_33 : f32 to vector<16x8xf32>
      %117 = arith.addf %110, %116 : vector<16x8xf32>
      %118 = math.absf %114 : vector<16x8xf32>
      %cst_34 = arith.constant 0.000000e+00 : f32
      %119 = vector.broadcast %cst_34 : f32 to vector<16x8xf32>
      %120 = arith.subf %119, %118 : vector<16x8xf32>
      %121 = math.exp %120 : vector<16x8xf32>
      %122 = math.log1p %121 : vector<16x8xf32>
      %123 = arith.addf %112, %122 : vector<16x8xf32>
      %124 = arith.select %115, %117, %123 : vector<16x8xi1>, vector<16x8xf32>
      %c0_35 = arith.constant 0 : index
      %c0_36 = arith.constant 0 : index
      %125 = vector.load %arg12[%c0_35, %c0_36] : memref<16x8xf32, #tpu.memory_space<vmem>>, vector<16x8xf32>
      tpu.vector_store %arg12[%c0_35, %c0_36], %124 {strides = array<i32>} : memref<16x8xf32, #tpu.memory_space<vmem>>, vector<16x8xf32>,
      %c0_37 = arith.constant 0 : index
      %c0_38 = arith.constant 0 : index
      %126 = vector.load %arg7[%c0_37, %c0_38] : memref<16x8xf32, #tpu.memory_space<vmem>>, vector<16x8xf32>
      %c0_39 = arith.constant 0 : index
      %c0_40 = arith.constant 0 : index
      %127 = vector.load %arg9[%c0_39, %c0_40] : memref<16x8xf32, #tpu.memory_space<vmem>>, vector<16x8xf32>
      %128 = arith.mulf %124, %127 : vector<16x8xf32>
      %129 = arith.addf %126, %128 : vector<16x8xf32>
      %c0_41 = arith.constant 0 : index
      %c0_42 = arith.constant 0 : index
      %130 = vector.load %arg11[%c0_41, %c0_42] : memref<16x8xf32, #tpu.memory_space<vmem>>, vector<16x8xf32>
      tpu.vector_store %arg11[%c0_41, %c0_42], %129 {strides = array<i32>} : memref<16x8xf32, #tpu.memory_space<vmem>>, vector<16x8xf32>,
    } else {
    }
    %c0_2 = arith.constant 0 : index
    %c0_3 = arith.constant 0 : index
    %7 = vector.load %arg5[%c0_2, %c0_3] : memref<8x128xf32, #tpu.memory_space<vmem>>, vector<8x128xf32>
    %c0_4 = arith.constant 0 : index
    %c0_5 = arith.constant 0 : index
    %8 = vector.load %arg6[%c0_4, %c0_5] : memref<8x128xf32, #tpu.memory_space<vmem>>, vector<8x128xf32>
    %9 = arith.addf %7, %8 : vector<8x128xf32>
    %10 = vector.broadcast %0 : f32 to vector<8x128xf32>
    %11 = arith.mulf %9, %10 : vector<8x128xf32>
    %cst = arith.constant dense<0xFF800000> : vector<128xf32>
    %12 = vector.multi_reduction <maximumf>, %11, %cst [0] : vector<8x128xf32> to vector<128xf32>
    %13 = vector.shape_cast %12 : vector<128xf32> to vector<1x128xf32>
    %14 = vector.broadcast %13 : vector<1x128xf32> to vector<8x128xf32>
    %15 = arith.subf %11, %14 : vector<8x128xf32>
    %16 = math.exp %15 : vector<8x128xf32>
    %cst_6 = arith.constant dense<0.000000e+00> : vector<128xf32>
    %17 = vector.multi_reduction <add>, %16, %cst_6 [0] : vector<8x128xf32> to vector<128xf32>
    %18 = vector.shape_cast %17 : vector<128xf32> to vector<1x128xf32>
    %19 = tpu.reciprocal %18 {approx = true} : vector<1x128xf32> -> vector<1x128xf32>
    %20 = arith.mulf %18, %19 : vector<1x128xf32>
    %cst_7 = arith.constant 2.000000e+00 : f32
    %21 = vector.broadcast %cst_7 : f32 to vector<1x128xf32>
    %22 = arith.subf %21, %20 : vector<1x128xf32>
    %23 = arith.mulf %19, %22 : vector<1x128xf32>
    %24 = vector.broadcast %23 : vector<1x128xf32> to vector<8x128xf32>
    %25 = arith.mulf %16, %24 : vector<8x128xf32>
    %c0_8 = arith.constant 0 : index
    %c0_9 = arith.constant 0 : index
    %26 = vector.load %arg11[%c0_8, %c0_9] : memref<16x8xf32, #tpu.memory_space<vmem>>, vector<16x8xf32>
    %cst_10 = arith.constant dense<0.000000e+00> : vector<16x128xf32>
    %27 = tpu.matmul %26, %25, %cst_10 {dimension_numbers = #tpu.dot_dimension_numbers<[1], [0], [0], [1], [0, 0, 1, 1], [], []>} : vector<16x8xf32>, vector<8x128xf32>, vector<16x128xf32> -> vector<16x128xf32>
    %28 = vector.extract_strided_slice %27 {offsets = [0, 0], sizes = [8, 128], strides = [1, 1]} : vector<16x128xf32> to vector<8x128xf32>
    %29 = vector.extract_strided_slice %27 {offsets = [8, 0], sizes = [8, 128], strides = [1, 1]} : vector<16x128xf32> to vector<8x128xf32>
    %cst_11 = arith.constant 0.000000e+00 : f32
    %30 = vector.broadcast %cst_11 : f32 to vector<8x128xf32>
    %31 = arith.maximumf %29, %30 : vector<8x128xf32>
    %32 = vector.broadcast %cst_11 : f32 to vector<8x128xf32>
    %33 = arith.subf %29, %32 : vector<8x128xf32>
    %34 = arith.cmpf one, %33, %33 : vector<8x128xf32>
    %35 = vector.broadcast %cst_11 : f32 to vector<8x128xf32>
    %36 = arith.addf %29, %35 : vector<8x128xf32>
    %37 = math.absf %33 : vector<8x128xf32>
    %cst_12 = arith.constant 0.000000e+00 : f32
    %38 = vector.broadcast %cst_12 : f32 to vector<8x128xf32>
    %39 = arith.subf %38, %37 : vector<8x128xf32>
    %40 = math.exp %39 : vector<8x128xf32>
    %41 = math.log1p %40 : vector<8x128xf32>
    %42 = arith.addf %31, %41 : vector<8x128xf32>
    %43 = arith.select %34, %36, %42 : vector<8x128xi1>, vector<8x128xf32>
    %cst_13 = arith.constant 1.000000e-15 : f32
    %44 = vector.broadcast %cst_13 : f32 to vector<8x128xf32>
    %45 = arith.addf %44, %43 : vector<8x128xf32>
    %46 = tpu.reciprocal %45 {approx = true} : vector<8x128xf32> -> vector<8x128xf32>
    %47 = arith.mulf %45, %46 : vector<8x128xf32>
    %cst_14 = arith.constant 2.000000e+00 : f32
    %48 = vector.broadcast %cst_14 : f32 to vector<8x128xf32>
    %49 = arith.subf %48, %47 : vector<8x128xf32>
    %50 = arith.mulf %46, %49 : vector<8x128xf32>
    %c0_15 = arith.constant 0 : index
    %c0_16 = arith.constant 0 : index
    %51 = vector.load %arg4[%c0_15, %c0_16] : memref<8x128xf32, #tpu.memory_space<vmem>>, vector<8x128xf32>
    %52 = arith.subf %51, %28 : vector<8x128xf32>
    %53 = arith.mulf %52, %50 : vector<8x128xf32>
    %cst_17 = arith.constant -5.000000e-01 : f32
    %54 = vector.broadcast %cst_17 : f32 to vector<8x128xf32>
    %55 = arith.mulf %54, %53 : vector<8x128xf32>
    %56 = arith.mulf %55, %53 : vector<8x128xf32>
    %57 = math.log %45 : vector<8x128xf32>
    %58 = arith.subf %56, %57 : vector<8x128xf32>
    %cst_18 = arith.constant dense<0.000000e+00> : vector<128xf32>
    %59 = vector.multi_reduction <add>, %58, %cst_18 [0] : vector<8x128xf32> to vector<128xf32>
    %60 = vector.shape_cast %59 : vector<128xf32> to vector<1x128xf32>
    %cst_19 = arith.constant 7.35150814 : f32
    %61 = vector.broadcast %cst_19 : f32 to vector<1x128xf32>
    %62 = arith.subf %60, %61 : vector<1x128xf32>
    %cst_20 = arith.constant dense<0xFF800000> : vector<128xf32>
    %63 = vector.multi_reduction <maximumf>, %7, %cst_20 [0] : vector<8x128xf32> to vector<128xf32>
    %64 = vector.shape_cast %63 : vector<128xf32> to vector<1x128xf32>
    %65 = vector.broadcast %64 : vector<1x128xf32> to vector<8x128xf32>
    %66 = arith.subf %7, %65 : vector<8x128xf32>
    %67 = math.exp %66 : vector<8x128xf32>
    %cst_21 = arith.constant dense<0.000000e+00> : vector<128xf32>
    %68 = vector.multi_reduction <add>, %67, %cst_21 [0] : vector<8x128xf32> to vector<128xf32>
    %69 = vector.shape_cast %68 : vector<128xf32> to vector<1x128xf32>
    %70 = tpu.reciprocal %69 {approx = true} : vector<1x128xf32> -> vector<1x128xf32>
    %71 = arith.mulf %69, %70 : vector<1x128xf32>
    %cst_22 = arith.constant 2.000000e+00 : f32
    %72 = vector.broadcast %cst_22 : f32 to vector<1x128xf32>
    %73 = arith.subf %72, %71 : vector<1x128xf32>
    %74 = arith.mulf %70, %73 : vector<1x128xf32>
    %75 = vector.broadcast %64 : vector<1x128xf32> to vector<8x128xf32>
    %76 = arith.subf %7, %75 : vector<8x128xf32>
    %77 = math.log %69 : vector<1x128xf32>
    %78 = vector.broadcast %77 : vector<1x128xf32> to vector<8x128xf32>
    %79 = arith.subf %76, %78 : vector<8x128xf32>
    %80 = vector.broadcast %74 : vector<1x128xf32> to vector<8x128xf32>
    %81 = arith.mulf %67, %80 : vector<8x128xf32>
    %cst_23 = arith.constant 2.07944155 : f32
    %82 = vector.broadcast %cst_23 : f32 to vector<8x128xf32>
    %83 = arith.addf %79, %82 : vector<8x128xf32>
    %84 = arith.mulf %81, %83 : vector<8x128xf32>
    %cst_24 = arith.constant dense<0.000000e+00> : vector<128xf32>
    %85 = vector.multi_reduction <add>, %84, %cst_24 [0] : vector<8x128xf32> to vector<128xf32>
    %86 = vector.shape_cast %85 : vector<128xf32> to vector<1x128xf32>
    %c1_i32 = arith.constant 1 : i32
    %87 = arith.muli %arg0, %c1_i32 : i32
    %88 = arith.addi %87, %arg1 : i32
    %c128_i32 = arith.constant 128 : i32
    %89 = arith.muli %88, %c128_i32 : i32
    %90 = tpu.iota {dimensions = array<i32: 1>} : vector<1x128xi32>
    %91 = vector.broadcast %89 : i32 to vector<1x128xi32>
    %92 = arith.addi %90, %91 : vector<1x128xi32>
    %93 = vector.broadcast %3 : i32 to vector<1x128xi32>
    %94 = arith.cmpi slt, %92, %93 : vector<1x128xi32>
    %95 = arith.extui %94 : vector<1x128xi1> to vector<1x128xi32>
    %96 = arith.sitofp %95 : vector<1x128xi32> to vector<1x128xf32>
    %97 = vector.broadcast %1 : f32 to vector<1x128xf32>
    %98 = arith.mulf %97, %86 : vector<1x128xf32>
    %99 = arith.subf %62, %98 : vector<1x128xf32>
    %100 = arith.mulf %96, %99 : vector<1x128xf32>
    %c0_i32_25 = arith.constant 0 : i32
    %101 = arith.cmpi eq, %arg1, %c0_i32_25 : i32
    %102 = arith.extui %101 : i1 to i32
    %c0_i32_26 = arith.constant 0 : i32
    %103 = arith.cmpi ne, %102, %c0_i32_26 : i32
    scf.if %103 {
      %c0_31 = arith.constant 0 : index
      %c0_32 = arith.constant 0 : index
      %110 = vector.load %arg13[%c0_31, %c0_32] : memref<1x128xf32, #tpu.memory_space<vmem>>, vector<1x128xf32>
      tpu.vector_store %arg13[%c0_31, %c0_32], %100 {strides = array<i32>} : memref<1x128xf32, #tpu.memory_space<vmem>>, vector<1x128xf32>,
    } else {
    }
    %c0_i32_27 = arith.constant 0 : i32
    %104 = arith.cmpi sgt, %arg1, %c0_i32_27 : i32
    %105 = arith.extui %104 : i1 to i32
    %c0_i32_28 = arith.constant 0 : i32
    %106 = arith.cmpi ne, %105, %c0_i32_28 : i32
    scf.if %106 {
      %c0_31 = arith.constant 0 : index
      %c0_32 = arith.constant 0 : index
      %110 = vector.load %arg13[%c0_31, %c0_32] : memref<1x128xf32, #tpu.memory_space<vmem>>, vector<1x128xf32>
      %111 = arith.addf %110, %100 : vector<1x128xf32>
      %c0_33 = arith.constant 0 : index
      %c0_34 = arith.constant 0 : index
      %112 = vector.load %arg13[%c0_33, %c0_34] : memref<1x128xf32, #tpu.memory_space<vmem>>, vector<1x128xf32>
      tpu.vector_store %arg13[%c0_33, %c0_34], %111 {strides = array<i32>} : memref<1x128xf32, #tpu.memory_space<vmem>>, vector<1x128xf32>,
    } else {
    }
    %c0_i32_29 = arith.constant 0 : i32
    %107 = arith.cmpi eq, %arg1, %c0_i32_29 : i32
    %108 = arith.extui %107 : i1 to i32
    %c0_i32_30 = arith.constant 0 : i32
    %109 = arith.cmpi ne, %108, %c0_i32_30 : i32
    scf.if %109 {
      %c0_31 = arith.constant 0 : index
      %c0_32 = arith.constant 0 : index
      %110 = vector.load %arg7[%c0_31, %c0_32] : memref<16x8xf32, #tpu.memory_space<vmem>>, vector<16x8xf32>
      %c0_33 = arith.constant 0 : index
      %c0_34 = arith.constant 0 : index
      %111 = vector.load %arg12[%c0_33, %c0_34] : memref<16x8xf32, #tpu.memory_space<vmem>>, vector<16x8xf32>
      %112 = math.log %111 : vector<16x8xf32>
      %cst_35 = arith.constant 0.000000e+00 : f32
      %113 = vector.broadcast %cst_35 : f32 to vector<16x8xf32>
      %114 = arith.subf %113, %112 : vector<16x8xf32>
      %115 = arith.mulf %111, %111 : vector<16x8xf32>
      %116 = arith.mulf %110, %110 : vector<16x8xf32>
      %117 = arith.addf %115, %116 : vector<16x8xf32>
      %cst_36 = arith.constant 1.000000e+00 : f32
      %118 = vector.broadcast %cst_36 : f32 to vector<16x8xf32>
      %119 = arith.subf %117, %118 : vector<16x8xf32>
      %cst_37 = arith.constant 5.000000e-01 : f32
      %120 = vector.broadcast %cst_37 : f32 to vector<16x8xf32>
      %121 = arith.mulf %120, %119 : vector<16x8xf32>
      %122 = arith.addf %114, %121 : vector<16x8xf32>
      %123 = vector.shape_cast %122 : vector<16x8xf32> to vector<1x16x8xf32>
      %cst_38 = arith.constant dense<0.000000e+00> : vector<1xf32>
      %124 = vector.multi_reduction <add>, %123, %cst_38 [1, 2] : vector<1x16x8xf32> to vector<1xf32>
      %125 = vector.shape_cast %124 : vector<1xf32> to vector<1x1x1xf32>
      %126 = vector.extract %125[0, 0, 0] : f32 from vector<1x1x1xf32>
      %127 = arith.mulf %126, %2 : f32
      %c0_i32_39 = arith.constant 0 : i32
      %128 = arith.cmpi eq, %arg0, %c0_i32_39 : i32
      %cst_40 = arith.constant 0.000000e+00 : f32
      %129 = arith.select %128, %127, %cst_40 : f32
      %130 = arith.mulf %1, %129 : f32
      %c0_41 = arith.constant 0 : index
      %c0_42 = arith.constant 0 : index
      %131 = vector.load %arg13[%c0_41, %c0_42] : memref<1x128xf32, #tpu.memory_space<vmem>>, vector<1x128xf32>
      %132 = vector.shape_cast %131 : vector<1x128xf32> to vector<1x1x128xf32>
      %cst_43 = arith.constant dense<0.000000e+00> : vector<1xf32>
      %133 = vector.multi_reduction <add>, %132, %cst_43 [1, 2] : vector<1x1x128xf32> to vector<1xf32>
      %134 = vector.shape_cast %133 : vector<1xf32> to vector<1x1x1xf32>
      %135 = vector.extract %134[0, 0, 0] : f32 from vector<1x1x1xf32>
      %136 = arith.subf %130, %135 : f32
      %137 = vector.broadcast %136 : f32 to vector<1x8x128xf32>
      %c0_44 = arith.constant 0 : index
      %c0_45 = arith.constant 0 : index
      %c0_46 = arith.constant 0 : index
      %138 = vector.load %arg10[%c0_44, %c0_45, %c0_46] : memref<1x8x128xf32, #tpu.memory_space<vmem>>, vector<1x8x128xf32>
      tpu.vector_store %arg10[%c0_44, %c0_45, %c0_46], %137 {strides = array<i32>} : memref<1x8x128xf32, #tpu.memory_space<vmem>>, vector<1x8x128xf32>,
    } else {
    }
    return
  }
  func.func @transform_0(%arg0: i32, %arg1: i32) -> i32 {
    %c0_i32 = arith.constant 0 : i32
    %c0_i32_0 = arith.constant 0 : i32
    return %c0_i32 : i32
  }
  func.func @transform_1(%arg0: i32, %arg1: i32) -> i32 {
    %c0_i32 = arith.constant 0 : i32
    %c0_i32_0 = arith.constant 0 : i32
    return %c0_i32 : i32
  }
  func.func @transform_2(%arg0: i32, %arg1: i32) -> (i32, i32) {
    %c1_i32 = arith.constant 1 : i32
    %0 = arith.muli %arg0, %c1_i32 : i32
    %1 = arith.addi %0, %arg1 : i32
    %c0_i32 = arith.constant 0 : i32
    %c0_i32_0 = arith.constant 0 : i32
    return %c0_i32, %1 : i32, i32
  }
  func.func @transform_3(%arg0: i32, %arg1: i32) -> (i32, i32) {
    %c1_i32 = arith.constant 1 : i32
    %0 = arith.muli %arg0, %c1_i32 : i32
    %1 = arith.addi %0, %arg1 : i32
    %c0_i32 = arith.constant 0 : i32
    %c0_i32_0 = arith.constant 0 : i32
    return %c0_i32, %1 : i32, i32
  }
  func.func @transform_4(%arg0: i32, %arg1: i32) -> (i32, i32) {
    %c1_i32 = arith.constant 1 : i32
    %0 = arith.muli %arg0, %c1_i32 : i32
    %1 = arith.addi %0, %arg1 : i32
    %c0_i32 = arith.constant 0 : i32
    %c0_i32_0 = arith.constant 0 : i32
    return %c0_i32, %1 : i32, i32
  }
  func.func @transform_5(%arg0: i32, %arg1: i32) -> (i32, i32) {
    %c0_i32 = arith.constant 0 : i32
    %c0_i32_0 = arith.constant 0 : i32
    %c0_i32_1 = arith.constant 0 : i32
    return %c0_i32, %c0_i32_0 : i32, i32
  }
  func.func @transform_6(%arg0: i32, %arg1: i32) -> (i32, i32) {
    %c0_i32 = arith.constant 0 : i32
    %c0_i32_0 = arith.constant 0 : i32
    %c0_i32_1 = arith.constant 0 : i32
    return %c0_i32, %c0_i32_0 : i32, i32
  }
  func.func @transform_7(%arg0: i32, %arg1: i32) -> (i32, i32) {
    %c0_i32 = arith.constant 0 : i32
    %c0_i32_0 = arith.constant 0 : i32
    %c0_i32_1 = arith.constant 0 : i32
    return %c0_i32, %c0_i32_0 : i32, i32
  }
  func.func @transform_8(%arg0: i32, %arg1: i32) -> (i32, i32, i32) {
    %c0_i32 = arith.constant 0 : i32
    %c0_i32_0 = arith.constant 0 : i32
    %c0_i32_1 = arith.constant 0 : i32
    return %arg0, %c0_i32, %c0_i32_0 : i32, i32, i32
  }
}

</mosaic_0001>

<bundles_post_ra>
// kernel: tpu_custom_call.1
= control target key start
LH: loop header
LB: loop body
LE: loop exit
PB: predicated region body
PF: predicated region fallthrough
CT: control target
= control target key end

     0   :  { %14 = vsyncpa [#allocation8], 0  ;;  %s648_s0 = inlined_call_operand.vmem [shape: f32[3], index: 0, kind: input, shape index: {}]   ;;  %s649_s1 = inlined_call_operand.<no memory space> [shape: s32[1], index: 1, kind: input, shape index: {}]   ;;  %s650_s2 = inlined_call_operand.vmem [shape: f32[8,128], index: 2, kind: input, shape index: {}]   ;;  %s651_s3 = inlined_call_operand.vmem [shape: f32[8,128], index: 3, kind: input, shape index: {}]   ;;  %s652_s4 = inlined_call_operand.vmem [shape: f32[8,128], index: 4, kind: input, shape index: {}]   ;;  %s653_s5 = inlined_call_operand.vmem [shape: f32[16,8], index: 5, kind: input, shape index: {}]   ;;  %s654_s6 = inlined_call_operand.vmem [shape: f32[16,8], index: 6, kind: input, shape index: {}]   ;;  %s655_s7 = inlined_call_operand.vmem [shape: f32[16,8], index: 7, kind: input, shape index: {}]   ;;  %s656_s8 = inlined_call_operand.hbm [shape: f32[1,8,128], index: 8, kind: output, shape index: {}]  }
   0x1   :  { %15 = vsyncpa [#allocation7], 0  ;;  %s22_s29 = sshll.u32 %s648_s0, 4  ;;  %s23_s29 = int_to_ptr.vmem [resolvable:$true] %s22_s29 }
   0x2   :  { %s499_s30 = scalar_lea.vmem %s23_s29, 16  ;;  %p504_p1 = scmp.lt.s32.totalorder %s23_s29, %s23_s29 }
   0x3   :  { %p500_p0 = scmp.ne.s32.totalorder %s23_s29, %s499_s30  ;;  %p505_p2 = scmp.lt.s32.totalorder %s499_s30, %s499_s30 }
   0x5   :  { %p506_p3 = por %p505_p2, %p504_p1 }
   0x7   :  { %p507_p4 = pnand %p506_p3, %p500_p0 }
   0x9   :  { %510 = shalt.err (!%p507_p4)
}
   0xa   :  { %s537_s9 = smov [#allocation6]  }
   0xb   :  { %25 = dma.vmem_to_smem %s23_s29, 16, %s537_s9, [#allocation8]  }
   0xc   :  { %533 = dma.done.wait [#allocation8], 16  }
   0xd   :  { %534 = vsyncadd [#allocation8], 4294967280 }
   0xe   :  { %61 = sfence }
   0xf   :  { %s95_s10 = sld [smem:[#allocation6]]  ;;  %v591_v0 = vld [vmem:[%s651_s3] sm:$0xff]  ;;  %v104_v3 = vld [vmem:[%s654_s6 + $0x8] sm:$0xff]  ;;  %vm141_vm4 = vcmask 64512   ;;  %s629_s23 = sld [smem:[#allocation6 + $0x1]]  ;;  %vm399_vm8 = vcmask 1040384  }
  0x10   :  { %v155_v1 = vld [vmem:[%s652_s4] sm:$0xff]  ;;  %v112_v5 = vand.u32 2147483647, %v104_v3  ;;  %v106_v36 = vmax.f32 %v104_v3, 0.0  ;;  %vm108_vm3 = vcmp.ne.f32.partialorder %v104_v3, %v104_v3  ;;  %v147_v45 = vld [vmem:[%s655_s7 + $0x8] sm:$0xff]  ;;  %s539_s28 = smov [#allocation9]  }
  0x11   :  { %v103_v2 = vld [vmem:[%s654_s6] sm:$0xff]  ;;  %v156_v6 = vadd.f32 %v155_v1, %v591_v0  ;;  %v145_v50 = vld [vmem:[%s653_s5 + $0x8] sm:$0xff]  ;;  %s419_s29 = sshll.u32 %s539_s28, 4  ;;  %s420_s29 = int_to_ptr.vmem [resolvable:$true] %s419_s29 }
  0x12   :  { %v111_v4 = vand.u32 2147483647, %v103_v2  ;;  %v114_v8 = vsub.f32 0.0, %v112_v5  ;;  %v105_v33 = vmax.f32 %v103_v2, 0.0  ;;  %vm107_vm2 = vcmp.ne.f32.partialorder %v103_v2, %v103_v2  ;;  %v146_v42 = vld [vmem:[%s655_s7] sm:$0xff]  ;;  %p516_p6 = scmp.lt.s32.totalorder %s420_s29, %s420_s29 }
  0x13   :  { %v144_v48 = vld [vmem:[%s653_s5] sm:$0xff] }
  0x14   :  { %v113_v7 = vsub.f32 0.0, %v111_v4  ;;  %v117_v11 = vmul.f32 1.442695, %v114_v8  ;;  %v372_v8 = vmul.f32 %v144_v48, %v144_v48 }
  0x15   :  { %v157_v10 = vstv %s95_s10  ;;  %s511_s10 = scalar_lea.vmem %s420_s29, 128 }
  0x16   :  { %v115_v9 = vmul.f32 1.442695, %v113_v7  ;;  %v158_v12 = vmul.f32 %v157_v10, %v156_v6  ;;  %p512_p5 = scmp.ne.s32.totalorder %s420_s29, %s511_s10  ;;  %p517_p7 = scmp.lt.s32.totalorder %s511_s10, %s511_s10 }
  0x18   :  { %469 = vpow2.f32 %v115_v9  ;;  %v159_v13 = vrot.slane %v158_v12, 4  ;;  %v373_v9 = vmul.f32 %v145_v50, %v145_v50  ;;  %p518_p8 = por %p517_p7, %p516_p6 }
  0x19   :  { %471 = vpow2.f32 %v117_v11 }
  0x1a   :  { %v160_v14 = vmax.f32 %v158_v12, %v159_v13  ;;  %p519_p9 = pnand %p518_p8, %p512_p5 }
  0x1c   :  { %v161_v15 = vrot.slane %v160_v14, 2 }
  0x1e   :  { %v162_v16 = vmax.f32 %v160_v14, %v161_v15 }
  0x20   :  { %v163_v18 = vrot.slane %v162_v16, 1 }
  0x22   :  { %v470_v17 = vpop.eup %469  ;;  %v164_v21 = vmax.f32 %v162_v16, %v163_v18 }
  0x23   :  { %v472_v19 = vpop.eup %471  ;;  %v119_v20 = vadd.f32 1.0, %v470_v17  ;;  %v122_v24 = vmul.f32 -0.5, %v470_v17  ;;  %v125_v28 = vand.u32 2147483647, %v470_v17 }
  0x24   :  { %v128_v22 = vadd.f32 1.0, %v472_v19  ;;  %v165_v23 = vsub.f32 %v158_v12, %v164_v21  ;;  %v131_v25 = vmul.f32 -0.5, %v472_v19  ;;  %v134_v30 = vand.u32 2147483647, %v472_v19 }
  0x25   :  { %473 = vlog2.f32 %v119_v20  ;;  %v123_v27 = vadd.f32 1.0, %v122_v24  ;;  %vm126_vm0 = vcmp.lt.f32.partialorder %v125_v28, 0.0004427343  ;;  %v301_v20 = vrot.slane %v591_v0, 4 }
  0x26   :  { %475 = vlog2.f32 %v128_v22  ;;  %v166_v26 = vmul.f32 1.442695, %v165_v23  ;;  %v132_v29 = vadd.f32 1.0, %v131_v25  ;;  %vm135_vm1 = vcmp.lt.f32.partialorder %v134_v30, 0.0004427343 }
  0x27   :  { %v124_v31 = vmul.f32 %v470_v17, %v123_v27 }
  0x28   :  { %477 = vpow2.f32 %v166_v26  ;;  %v133_v34 = vmul.f32 %v472_v19, %v132_v29  ;;  %v302_v26 = vmax.f32 %v591_v0, %v301_v20 }
  0x2a   :  { %v303_v29 = vrot.slane %v302_v26, 2 }
  0x2c   :  { %v304_v30 = vmax.f32 %v302_v26, %v303_v29 }
  0x2f   :  { %v474_v32 = vpop.eup %473 }
  0x30   :  { %v476_v35 = vpop.eup %475  ;;  %v121_v37 = vmul.f32 0.6931472, %v474_v32 }
  0x31   :  { %v130_v38 = vmul.f32 0.6931472, %v476_v35 }
  0x32   :  { %v127_v39 = vsel %vm126_vm0, %v124_v31, %v121_v37  ;;  %v478_v43 = vpop.eup %477  ;;  %v305_v31 = vrot.slane %v304_v30, 1 }
  0x33   :  { %v136_v40 = vsel %vm135_vm1, %v133_v34, %v130_v38  ;;  %v137_v41 = vadd.f32 %v127_v39, %v105_v33  ;;  %v168_v46 = vrot.slane %v478_v43, 4 }
  0x34   :  { %v138_v44 = vadd.f32 %v136_v40, %v106_v36  ;;  %v306_v32 = vmax.f32 %v304_v30, %v305_v31  ;;  %v338_v30 = vstv %s649_s1  ;;  %v342_v31 = vstv %s629_s23  ;;  %s447_s1 = sld [smem:[#allocation6 + $0x2]] }
  0x35   :  { %v139_v47 = vsel %vm107_vm2, %v103_v2, %v137_v41  ;;  %v169_v52 = vadd.f32 %v478_v43, %v168_v46 }
  0x36   :  { %v140_v49 = vsel %vm108_vm3, %v104_v3, %v138_v44  ;;  %142 = vst.msk [vmem:[#allocation3] sm:$0xff] %vm141_vm4, %v139_v47  ;;  %v148_v51 = vmul.f32 %v146_v42, %v139_v47  ;;  %v307_v33 = vsub.f32 %v591_v0, %v306_v32 }
  0x37   :  { %143 = vst.msk [vmem:[#allocation3 + $0x8] sm:$0xff] %vm141_vm4, %v140_v49  ;;  %v149_v53 = vmul.f32 %v147_v45, %v140_v49  ;;  %v170_v55 = vrot.slane %v169_v52, 2 }
  0x38   :  { %v150_v54 = vadd.f32 %v148_v51, %v144_v48  ;;  %v308_v34 = vmul.f32 1.442695, %v307_v33 }
  0x39   :  { %v151_v56 = vadd.f32 %v149_v53, %v145_v50  ;;  %v171_v57 = vadd.f32 %v170_v55, %v169_v52 }
  0x3a   :  { %152 = vst.msk [vmem:[#allocation2] sm:$0xff] %vm141_vm4, %v150_v54 }
  0x3b   :  { %153 = vst.msk [vmem:[#allocation2 + $0x8] sm:$0xff] %vm141_vm4, %v151_v56  ;;  %v172_v58 = vrot.slane %v171_v57, 1 }
  0x3d   :  { %v173_v59 = vadd.f32 %v172_v58, %v171_v57  ;;  %v362_v4 = vld [vmem:[#allocation3] sm:$0xff] }
  0x3e   :  { %v363_v5 = vld [vmem:[#allocation3 + $0x8] sm:$0xff]  ;;  %v370_v6 = vmul.f32 %v362_v4, %v362_v4 }
  0x3f   :  { %479 = vrcp.f32 %v173_v59  ;;  %v371_v7 = vmul.f32 %v363_v5, %v363_v5 }
  0x40   :  { %481 = vlog2.f32 %v362_v4  ;;  %v374_v10 = vadd.f32 %v372_v8, %v370_v6 }
  0x41   :  { %v179_v60 = vld [vmem:[#allocation2] sm:$0xff]  ;;  %483 = vlog2.f32 %v363_v5  ;;  %v375_v12 = vadd.f32 %v373_v9, %v371_v7 }
  0x42   :  { %459 = vmatprep.mubr.msk.f32.mxu0 %vm141_vm4, %v179_v60  ;;  %v180_v3 = vld [vmem:[#allocation2 + $0x8] sm:$0xff]  ;;  %v452_v15 = vadd.f32 -1.0, %v374_v10  ;;  %485 = vpow2.f32 %v308_v34  ;;  %v286_v9 = vld [vmem:[%s650_s2] sm:$0xff] }
  0x43   :  { %v453_v17 = vadd.f32 -1.0, %v375_v12 }
  0x44   :  { %v378_v19 = vmul.f32 0.5, %v452_v15 }
  0x45   :  { %v379_v22 = vmul.f32 0.5, %v453_v17 }
  0x49   :  { %v480_v61 = vpop.eup %479 }
  0x4a   :  { %v175_v62 = vmul.f32 %v480_v61, %v173_v59  ;;  %v482_v11 = vpop.eup %481 }
  0x4b   :  { %v484_v13 = vpop.eup %483  ;;  %v365_v14 = vmul.f32 0.6931472, %v482_v11 }
  0x4c   :  { %v176_v63 = vsub.f32 2.0, %v175_v62  ;;  %v367_v16 = vmul.f32 0.6931472, %v484_v13  ;;  %v486_v35 = vpop.eup %485 }
  0x4d   :  { %v368_v18 = vsub.f32 0.0, %v365_v14  ;;  %v310_v36 = vrot.slane %v486_v35, 4 }
  0x4e   :  { %v177_v1 = vmul.f32 %v480_v61, %v176_v63  ;;  %v369_v21 = vsub.f32 0.0, %v367_v16 }
  0x4f   :  { %v380_v23 = vadd.f32 %v378_v19, %v368_v18  ;;  %v311_v37 = vadd.f32 %v486_v35, %v310_v36  ;;  %v538_v36 = vmov 0.0  }
  0x50   :  { %v178_v2 = vmul.f32 %v478_v43, %v177_v1  ;;  %v381_v24 = vadd.f32 %v379_v22, %v369_v21 }
  0x51   :  { %v382_v25 = vsel %vm141_vm4, %v380_v23, 0.0  ;;  %v312_v41 = vrot.slane %v311_v37, 2 }
  0x52   :  { %457 = vmatprep.subr.mxu0 %v178_v2  ;;  %v383_v27 = vsel %vm141_vm4, %v381_v24, 0.0 }
  0x53   :  { %458 = vmatpush3.msra.mxu0 %v178_v2  ;;  %v384_v28 = vadd.f32 %v383_v27, %v382_v25  ;;  %v313_v44 = vadd.f32 %v312_v41, %v311_v37  ;;  %v334_v25 = vlaneseq }
  0x54   :  { %460 = vmatmul.mubr.msk.f32.vlgmr.msra.gmra.mrb[0].mxu0 %vm141_vm4, %v180_v3 }
  0x55   :  { %385 = vadd.xlane.f32.xlu0 %v384_v28  ;;  %v314_v45 = vrot.slane %v313_v44, 1  ;;  %v335_v29 = vand.u32 127, %v334_v25 }
  0x57   :  { %v315_v46 = vadd.f32 %v314_v45, %v313_v44  ;;  %vm339_vm7 = vcmp.lt.s32.totalorder %v335_v29, %v338_v30 }
  0x58   :  { %v451_v37 = vsel %vm339_vm7, 1.0, %v538_v36 }
 0x127   :  { %v461_v38 = vpop.f32.mrb[0].mxu0 }
 0x128   :  { %v266_v39 = vand.u32 2147483647, %v461_v38  ;;  %v254_v40 = vpop.f32.mrb[1].mxu0  ;;  %v263_v57 = vmax.f32 %v461_v38, 0.0  ;;  %vm264_vm6 = vcmp.ne.f32.partialorder %v461_v38, %v461_v38 }
 0x129   :  { %v287_v12 = vsub.f32 %v286_v9, %v254_v40 }
 0x12a   :  { %v267_v42 = vsub.f32 0.0, %v266_v39 }
 0x12c   :  { %v268_v43 = vmul.f32 1.442695, %v267_v42  ;;  %v386_v42 = vpop.xlane.xlu0 %385 }
 0x12e   :  { %487 = vpow2.f32 %v268_v43  ;;  %v387_v43 = vrot.slane %v386_v42, 4 }
 0x12f   :  { %489 = vrcp.f32 %v315_v46 }
 0x130   :  { %v388_v44 = vadd.f32 %v387_v43, %v386_v42 }
 0x132   :  { %v389_v45 = vrot.slane %v388_v44, 2 }
 0x138   :  { %v488_v47 = vpop.eup %487 }
 0x139   :  { %v270_v48 = vadd.f32 1.0, %v488_v47  ;;  %v273_v0 = vmul.f32 -0.5, %v488_v47  ;;  %v490_v49 = vpop.eup %489  ;;  %v276_v51 = vand.u32 2147483647, %v488_v47 }
 0x13a   :  { %v317_v53 = vmul.f32 %v490_v49, %v315_v46 }
 0x13b   :  { %491 = vlog2.f32 %v270_v48  ;;  %v274_v50 = vadd.f32 1.0, %v273_v0  ;;  %vm277_vm5 = vcmp.lt.f32.partialorder %v276_v51, 0.0004427343 }
 0x13c   :  { %493 = vlog2.f32 %v315_v46  ;;  %v318_v60 = vsub.f32 2.0, %v317_v53  ;;  %v390_v46 = vadd.f32 %v389_v45, %v388_v44 }
 0x13d   :  { %v275_v56 = vmul.f32 %v488_v47, %v274_v50 }
 0x13e   :  { %v319_v1 = vmul.f32 %v490_v49, %v318_v60  ;;  %v391_v47 = vrot.slane %v390_v46, 1 }
 0x140   :  { %v323_v3 = vmul.f32 %v486_v35, %v319_v1  ;;  %v392_v48 = vadd.f32 %v391_v47, %v390_v46 }
 0x142   :  { %462 = vpush %v392_v48 }
 0x145   :  { %v492_v52 = vpop.eup %491 }
 0x146   :  { %v494_v54 = vpop.eup %493  ;;  %v272_v55 = vmul.f32 0.6931472, %v492_v52 }
 0x147   :  { %v321_v61 = vmul.f32 0.6931472, %v494_v54 }
 0x148   :  { %v278_v58 = vsel %vm277_vm5, %v275_v56, %v272_v55 }
 0x149   :  { %v279_v59 = vadd.f32 %v278_v58, %v263_v57  ;;  %v322_v2 = vsub.f32 %v307_v33, %v321_v61 }
 0x14b   :  { %v280_v62 = vsel %vm264_vm6, %v461_v38, %v279_v59  ;;  %v324_v4 = vadd.f32 2.0794415, %v322_v2 }
 0x14c   :  { %v281_v63 = vadd.f32 1e-15, %v280_v62 }
 0x14d   :  { %v325_v5 = vmul.f32 %v324_v4, %v323_v3 }
 0x14e   :  { %495 = vrcp.f32 %v281_v63 }
 0x14f   :  { %497 = vlog2.f32 %v281_v63  ;;  %v326_v8 = vrot.slane %v325_v5, 4 }
 0x151   :  { %v327_v13 = vadd.f32 %v326_v8, %v325_v5 }
 0x153   :  { %v328_v17 = vrot.slane %v327_v13, 2 }
 0x155   :  { %v329_v21 = vadd.f32 %v328_v17, %v327_v13 }
 0x157   :  { %v330_v24 = vrot.slane %v329_v21, 1 }
 0x158   :  { %v496_v6 = vpop.eup %495 }
 0x159   :  { %v283_v7 = vmul.f32 %v496_v6, %v281_v63  ;;  %v498_v15 = vpop.eup %497  ;;  %v331_v28 = vadd.f32 %v330_v24, %v329_v21 }
 0x15a   :  { %v292_v19 = vmul.f32 0.6931472, %v498_v15 }
 0x15b   :  { %v284_v10 = vsub.f32 2.0, %v283_v7  ;;  %v343_v34 = vmul.f32 %v342_v31, %v331_v28 }
 0x15d   :  { %v285_v11 = vmul.f32 %v496_v6, %v284_v10 }
 0x15f   :  { %v288_v14 = vmul.f32 %v287_v12, %v285_v11 }
 0x161   :  { %v289_v16 = vmul.f32 -0.5, %v288_v14 }
 0x163   :  { %v290_v18 = vmul.f32 %v289_v16, %v288_v14 }
 0x165   :  { %v293_v20 = vsub.f32 %v290_v18, %v292_v19 }
 0x167   :  { %v294_v22 = vrot.slane %v293_v20, 4 }
 0x169   :  { %v295_v23 = vadd.f32 %v294_v22, %v293_v20 }
 0x16b   :  { %v296_v26 = vrot.slane %v295_v23, 2 }
 0x16d   :  { %v297_v27 = vadd.f32 %v296_v26, %v295_v23 }
 0x16f   :  { %v298_v32 = vrot.slane %v297_v27, 1 }
 0x171   :  { %v299_v33 = vadd.f32 %v298_v32, %v297_v27 }
 0x173   :  { %v450_v35 = vadd.f32 -7.351508, %v299_v33  ;;  %s463_s25 = spop %462 }
 0x174   :  { %s394_s26 = smul.f32 %s463_s25, %s447_s1 }
 0x175   :  { %v344_v38 = vsub.f32 %v450_v35, %v343_v34 }
 0x176   :  { %s397_s27 = smul.f32 %s629_s23, %s394_s26 }
 0x177   :  { %v345_v39 = vmul.f32 %v451_v37, %v344_v38 }
 0x179   :  { %349 = vst [vmem:[#allocation4] sm:$0x1] %v345_v39 }
 0x180   :  { %v398_v40 = vld [vmem:[#allocation4] sm:$0x1] }
 0x181   :  { %v400_v41 = vsel %vm399_vm8, %v398_v40, 0.0 }
 0x182   :  { %401 = vadd.xlane.f32.xlu0 %v400_v41 }
 0x20f   :  { %v402_v0 = vpop.xlane.xlu0 %401 }
 0x210   :  { %v403_v49 = vrot.slane %v402_v0, 4 }
 0x212   :  { %v404_v50 = vadd.f32 %v403_v49, %v402_v0 }
 0x214   :  { %v405_v51 = vrot.slane %v404_v50, 2 }
 0x216   :  { %v406_v52 = vadd.f32 %v405_v51, %v404_v50 }
 0x218   :  { %v407_v53 = vrot.slane %v406_v52, 1 }
 0x21a   :  { %v408_v54 = vadd.f32 %v407_v53, %v406_v52 }
 0x21c   :  { %464 = vpush %v408_v54 }
 0x24d   :  { %s465_s30 = spop %464 }
 0x24e   :  { %s410_s9 = ssub.f32 %s397_s27, %s465_s30 }
 0x250   :  { %v411_v55 = vstv %s410_s9 }
 0x251   :  { %412 = vst [vmem:[#allocation9] sm:$0xff] %v411_v55 }
 0x252   :  { %522 = shalt.err (!%p519_p9)
}
 0x253   :  { %s523_s0 = scalar_lea.hbm %s656_s8, 128 }
 0x254   :  { %p524_p10 = scmp.ne.s32.totalorder %s656_s8, %s523_s0  ;;  %p527_p11 = scmp.lt.u32.totalorder %s523_s0, %s656_s8 }
 0x256   :  { %p529_p12 = pnand %p527_p11, %p524_p10 }
 0x258   :  { %532 = shalt.err (!%p529_p12)
}
 0x259   :  { %422 = dma.vmem_to_hbm [thread:$0]  %s420_s29, 128, %s656_s8, [#allocation7]  }
 0x25a   :  { %535 = dma.done.wait [#allocation7], 128  }
 0x25b   :  { %536 = vsyncadd [#allocation7], 4294967168 }
 0x25c   :  { %426 = vsyncpa [#allocation7], 1 }
 0x25d   :  { %427 = vsyncpa [#allocation8], 1 }

</bundles_post_ra>
